<compile_context>
chip_gen: v7x
topology: tpu7x:2x2x1
jax: 0.10.0
libtpu: 0.0.40
codegen_flags: <defaults>
</compile_context>

<pallas_src>
import functools

import jax
import jax.numpy as jnp
from jax.experimental import pallas as pl
from jax.experimental.pallas import tpu as pltpu

LANE = 128
SUBTILE = 32                            # block sublane granularity: covers f32 (8) and int8 (32)
TARGET_BLOCK_BYTES = 2 * 1024 * 1024    # ~2 MiB of logits per tile (double-buffered)


def _num_spatial_chunks():
    """1 on single-TensorCore chips (v5e/v6e); 2 on v7x (2 TCs/chip)."""
    try:
        kind = jax.devices()[0].device_kind.lower()
    except Exception:
        return 1
    return 2 if ("v7" in kind or "tpu7" in kind) else 1


def _dc_ce_kernel(logits_ref, labels_ref, out_ref, acc_ref, *, C, R_ACC, needs_mask):
    """Streaming DC+CE statistics.

    logits_ref: (1, C, TS, 128) f32   lane-dense per-channel tiles
    labels_ref: (1, 1, TS, 128) i8    pad pixels carry -1
    out_ref   : (1, 1, R_ACC, 128) f32, written once per (batch, chunk)
    acc_ref   : (R_ACC, 128) f32 VMEM scratch, resident across the k axis
      rows [0, C)   : per-class tp           (lane partial sums)
      rows [C, 2C)  : per-class sum(softmax)
      rows [2C, 3C) : per-class label count
      row  3C       : cross-entropy partial sum
    """
    k = pl.program_id(2)

    @pl.when(k == 0)
    def _init():
        acc_ref[...] = jnp.zeros_like(acc_ref)

    labels = labels_ref[0, 0].astype(jnp.int32)              # (TS, 128)

    # Channel ops over a small unrolled C axis; every operand is a dense
    # (TS, 128) slab -> full-vreg VPU/EUP work, no cross-sublane broadcasts.
    logit_c = [logits_ref[0, c] for c in range(C)]            # C x (TS, 128)
    m = logit_c[0]
    for c in range(1, C):
        m = jnp.maximum(m, logit_c[c])
    e_c = [jnp.exp(logit_c[c] - m) for c in range(C)]
    z = e_c[0]
    for c in range(1, C):
        z = z + e_c[c]
    inv_z = 1.0 / z                                           # exact (keeps 1e-5 tol)
    lse = jnp.log(z) + m

    # picked = logits[label] via per-class selects (no iota / one-hot tensors).
    picked = jnp.zeros_like(m)
    for c in range(C):
        picked = jnp.where(labels == c, logit_c[c], picked)
    ce_pp = lse - picked

    if needs_mask:
        valid = labels >= 0                                   # pad pixels carry -1
        inv_z = jnp.where(valid, inv_z, 0.0)                  # zeros softmax at pads
        ce_pp = jnp.where(valid, ce_pp, 0.0)

    # Per-class lane-vector partials (reduce over sublanes only), accumulated in
    # the resident VMEM scratch with a single full-vreg add per grid step.
    # TODO(synk): on v7x, if a bundle dump still shows the VPU saturating after
    # this layout, offload these lane reductions to the idle MXU via a dot
    # against a [inv_z, ones] matrix; and add pipeline_mode=pl.Buffered(3) on
    # the logits BlockSpec only if DMA is exposed.
    tp_rows, sm_rows, cnt_rows = [], [], []
    for c in range(C):
        sm_c = e_c[c] * inv_z                                 # softmax prob (0 at pads)
        mask_c = labels == c
        tp_rows.append(jnp.sum(jnp.where(mask_c, sm_c, 0.0), axis=0, keepdims=True))
        sm_rows.append(jnp.sum(sm_c, axis=0, keepdims=True))
        cnt_rows.append(jnp.sum(mask_c.astype(jnp.float32), axis=0, keepdims=True))
    rows = tp_rows + sm_rows + cnt_rows
    rows.append(jnp.sum(ce_pp, axis=0, keepdims=True))
    pad_rows = R_ACC - (3 * C + 1)
    if pad_rows:
        rows.append(jnp.zeros((pad_rows, LANE), jnp.float32))
    acc_ref[...] += jnp.concatenate(rows, axis=0)             # (R_ACC, 128)

    @pl.when(k == pl.num_programs(2) - 1)
    def _done():
        out_ref[0, 0] = acc_ref[...]                          # one unmasked 128-lane store


def dc_and_ce_loss(net_output, target, smooth=1.0):
    """net_output: (B, C, *spatial) f32 logits; target: (B, 1, *spatial) int labels."""
    B, C = net_output.shape[:2]
    N = 1
    for s in net_output.shape[2:]:
        N *= s

    logits = net_output.reshape(B, C, N).astype(jnp.float32)
    labels = target.reshape(B, 1, N).astype(jnp.int8)          # ~4x less label HBM traffic

    num_chunks = _num_spatial_chunks()

    # Tile derivation: lane-dense (TS, 128) rows; TS multiple of 32 so both the
    # f32 logits blocks and the int8 label blocks tile natively.
    R = pl.cdiv(N, LANE)
    target_rows = max(SUBTILE,
                      (TARGET_BLOCK_BYTES // (4 * C * LANE) // SUBTILE) * SUBTILE)
    per_chunk = pl.cdiv(R, num_chunks)
    kt = max(1, pl.cdiv(per_chunk, target_rows))
    TS = ((pl.cdiv(per_chunk, kt) + SUBTILE - 1) // SUBTILE) * SUBTILE
    r_pad = num_chunks * kt * TS
    n_pad = r_pad * LANE
    needs_mask = n_pad != N
    if needs_mask:
        pad = n_pad - N
        logits = jnp.pad(logits, ((0, 0), (0, 0), (0, pad)))
        labels = jnp.pad(labels, ((0, 0), (0, 0), (0, pad)), constant_values=-1)

    logits = logits.reshape(B, C, r_pad, LANE)
    labels = labels.reshape(B, 1, r_pad, LANE)

    R_ACC = ((3 * C + 1 + 7) // 8) * 8                          # stats slab rows (8-aligned)

    kernel = functools.partial(_dc_ce_kernel, C=C, R_ACC=R_ACC, needs_mask=needs_mask)

    stats = pl.pallas_call(
        kernel,
        out_shape=jax.ShapeDtypeStruct((B, num_chunks, R_ACC, LANE), jnp.float32),
        grid_spec=pltpu.PrefetchScalarGridSpec(
            num_scalar_prefetch=0,
            grid=(B, num_chunks, kt),
            in_specs=[
                pl.BlockSpec((1, C, TS, LANE), lambda b, c, k: (b, 0, c * kt + k, 0)),
                pl.BlockSpec((1, 1, TS, LANE), lambda b, c, k: (b, 0, c * kt + k, 0)),
            ],
            out_specs=pl.BlockSpec((1, 1, R_ACC, LANE), lambda b, c, k: (b, c, 0, 0)),
            scratch_shapes=[pltpu.VMEM((R_ACC, LANE), jnp.float32)],
        ),
        compiler_params=pltpu.CompilerParams(
            dimension_semantics=("parallel", "parallel", "arbitrary"),
            vmem_limit_bytes=32 * 1024 * 1024,
        ),
    )(logits, labels)

    # Combine chunk + lane partials (tree-sum in XLA glue).
    per_b = jnp.sum(stats, axis=(1, 3))                         # (B, R_ACC)
    tp = per_b[:, 0:C]
    sum_sm = per_b[:, C:2 * C]
    count = per_b[:, 2 * C:3 * C]
    ce_sum = per_b[:, 3 * C]

    fp = sum_sm - tp
    fn = count - tp

    # SoftDiceLoss tail (batch_dice=False, do_bg=True, square=False): mean(1 - dc)
    dc = (2.0 * tp + smooth) / (2.0 * tp + fp + fn + smooth)
    dc_loss = jnp.mean(1.0 - dc)

    # nn.CrossEntropyLoss default reduction: mean over all pixels
    ce_loss = jnp.sum(ce_sum) / (B * N)

    return ce_loss + dc_loss


def _reference_loss(net_output, target, smooth=1.0):
    """Pure-JAX reference mirroring the PyTorch module, for a sanity check."""
    B, C = net_output.shape[:2]
    x = jax.nn.softmax(net_output, axis=1)
    onehot = jax.nn.one_hot(target[:, 0], C, axis=1, dtype=jnp.float32)
    red_axes = tuple(range(2, net_output.ndim))
    tp = jnp.sum(x * onehot, axis=red_axes)
    fp = jnp.sum(x * (1.0 - onehot), axis=red_axes)
    fn = jnp.sum((1.0 - x) * onehot, axis=red_axes)
    dc = (2.0 * tp + smooth) / (2.0 * tp + fp + fn + smooth)
    dc_loss = jnp.mean(1.0 - dc)
    logp = jax.nn.log_softmax(net_output, axis=1)
    ce = -jnp.sum(onehot * logp, axis=1)
    ce_loss = jnp.mean(ce)
    return ce_loss + dc_loss


if __name__ == "__main__":
    key = jax.random.PRNGKey(0)
    k1, k2, k3, k4 = jax.random.split(key, 4)

    # Case 1: small aligned-ish case (B=2, C=4, 16x16)
    B, C, H, W = 2, 4, 16, 16
    net_output = jax.random.normal(k1, (B, C, H, W), dtype=jnp.float32)
    target = jax.random.randint(k2, (B, 1, H, W), 0, C, dtype=jnp.int32)
    loss = jax.block_until_ready(dc_and_ce_loss(net_output, target))
    ref = jax.block_until_ready(_reference_loss(net_output, target))
    assert jnp.allclose(loss, ref, atol=1e-5, rtol=1e-5), (loss, ref)

    # Case 2: odd spatial size + C=3 (exercises padding / mask path)
    B2, C2, H2, W2 = 2, 3, 15, 13
    net_output2 = jax.random.normal(k3, (B2, C2, H2, W2), dtype=jnp.float32)
    target2 = jax.random.randint(k4, (B2, 1, H2, W2), 0, C2, dtype=jnp.int32)
    loss2 = jax.block_until_ready(dc_and_ce_loss(net_output2, target2))
    ref2 = jax.block_until_ready(_reference_loss(net_output2, target2))
    assert jnp.allclose(loss2, ref2, atol=1e-5, rtol=1e-5), (loss2, ref2)

    print("KERNEL_OK")
</pallas_src>

<mosaic_0001>
module attributes {stable_mosaic.version = 11 : i64} {
  func.func @_dc_ce_kernel(%arg0: i32, %arg1: i32, %arg2: i32, %arg3: memref<1x4x32x128xf32, #tpu.memory_space<vmem>>, %arg4: memref<1x1x32x128xi8, #tpu.memory_space<vmem>>, %arg5: memref<1x1x16x128xf32, #tpu.memory_space<vmem>>, %arg6: memref<16x128xf32, #tpu.memory_space<vmem>>) attributes {dimension_semantics = [#tpu.dimension_semantics<parallel>, #tpu.dimension_semantics<parallel>, #tpu.dimension_semantics<arbitrary>], iteration_bounds = array<i64: 2, 1, 1>, scalar_prefetch = 0 : i64, scratch_operands = 1 : i64, tpu.core_type = #tpu.core_type<tc>, window_params = [{transform_indices = @transform_0, window_bounds = array<i64: 1, 4, 32, 128>}, {transform_indices = @transform_1, window_bounds = array<i64: 1, 1, 32, 128>}, {transform_indices = @transform_2, window_bounds = array<i64: 1, 1, 16, 128>}]} {
    %c0_i32 = arith.constant 0 : i32
    %0 = arith.cmpi eq, %arg2, %c0_i32 : i32
    %1 = arith.extui %0 : i1 to i32
    %c0_i32_0 = arith.constant 0 : i32
    %2 = arith.cmpi ne, %1, %c0_i32_0 : i32
    scf.if %2 {
      %cst_50 = arith.constant 0.000000e+00 : f32
      %114 = vector.broadcast %cst_50 : f32 to vector<16x128xf32>
      %c0_51 = arith.constant 0 : index
      %c0_52 = arith.constant 0 : index
      %115 = vector.load %arg6[%c0_51, %c0_52] : memref<16x128xf32, #tpu.memory_space<vmem>>, vector<16x128xf32>
      tpu.vector_store %arg6[%c0_51, %c0_52], %114 {strides = array<i32>} : memref<16x128xf32, #tpu.memory_space<vmem>>, vector<16x128xf32>,
    } else {
    }
    %c0 = arith.constant 0 : index
    %c0_1 = arith.constant 0 : index
    %c0_2 = arith.constant 0 : index
    %c0_3 = arith.constant 0 : index
    %3 = vector.load %arg4[%c0, %c0_1, %c0_2, %c0_3] : memref<1x1x32x128xi8, #tpu.memory_space<vmem>>, vector<1x1x32x128xi8>
    %4 = vector.shape_cast %3 : vector<1x1x32x128xi8> to vector<32x128xi8>
    %5 = arith.extsi %4 : vector<32x128xi8> to vector<32x128xi32>
    %c0_4 = arith.constant 0 : index
    %c0_5 = arith.constant 0 : index
    %c0_6 = arith.constant 0 : index
    %c0_7 = arith.constant 0 : index
    %6 = vector.load %arg3[%c0_4, %c0_5, %c0_6, %c0_7] : memref<1x4x32x128xf32, #tpu.memory_space<vmem>>, vector<1x1x32x128xf32>
    %7 = vector.shape_cast %6 : vector<1x1x32x128xf32> to vector<32x128xf32>
    %c0_8 = arith.constant 0 : index
    %c1 = arith.constant 1 : index
    %c0_9 = arith.constant 0 : index
    %c0_10 = arith.constant 0 : index
    %8 = vector.load %arg3[%c0_8, %c1, %c0_9, %c0_10] : memref<1x4x32x128xf32, #tpu.memory_space<vmem>>, vector<1x1x32x128xf32>
    %9 = vector.shape_cast %8 : vector<1x1x32x128xf32> to vector<32x128xf32>
    %c0_11 = arith.constant 0 : index
    %c2 = arith.constant 2 : index
    %c0_12 = arith.constant 0 : index
    %c0_13 = arith.constant 0 : index
    %10 = vector.load %arg3[%c0_11, %c2, %c0_12, %c0_13] : memref<1x4x32x128xf32, #tpu.memory_space<vmem>>, vector<1x1x32x128xf32>
    %11 = vector.shape_cast %10 : vector<1x1x32x128xf32> to vector<32x128xf32>
    %c0_14 = arith.constant 0 : index
    %c3 = arith.constant 3 : index
    %c0_15 = arith.constant 0 : index
    %c0_16 = arith.constant 0 : index
    %12 = vector.load %arg3[%c0_14, %c3, %c0_15, %c0_16] : memref<1x4x32x128xf32, #tpu.memory_space<vmem>>, vector<1x1x32x128xf32>
    %13 = vector.shape_cast %12 : vector<1x1x32x128xf32> to vector<32x128xf32>
    %14 = arith.maximumf %7, %9 : vector<32x128xf32>
    %15 = arith.maximumf %14, %11 : vector<32x128xf32>
    %16 = arith.maximumf %15, %13 : vector<32x128xf32>
    %17 = arith.subf %7, %16 : vector<32x128xf32>
    %18 = math.exp %17 : vector<32x128xf32>
    %19 = arith.subf %9, %16 : vector<32x128xf32>
    %20 = math.exp %19 : vector<32x128xf32>
    %21 = arith.subf %11, %16 : vector<32x128xf32>
    %22 = math.exp %21 : vector<32x128xf32>
    %23 = arith.subf %13, %16 : vector<32x128xf32>
    %24 = math.exp %23 : vector<32x128xf32>
    %25 = arith.addf %18, %20 : vector<32x128xf32>
    %26 = arith.addf %25, %22 : vector<32x128xf32>
    %27 = arith.addf %26, %24 : vector<32x128xf32>
    %cst = arith.constant 1.000000e+00 : f32
    %28 = vector.broadcast %cst : f32 to vector<32x128xf32>
    %29 = arith.divf %28, %27 : vector<32x128xf32>
    %30 = math.log %27 : vector<32x128xf32>
    %31 = arith.addf %30, %16 : vector<32x128xf32>
    %cst_17 = arith.constant 0.000000e+00 : f32
    %32 = vector.broadcast %cst_17 : f32 to vector<32x128xf32>
    %c0_i32_18 = arith.constant 0 : i32
    %33 = vector.broadcast %c0_i32_18 : i32 to vector<32x128xi32>
    %34 = arith.cmpi eq, %5, %33 : vector<32x128xi32>
    %35 = arith.select %34, %7, %32 : vector<32x128xi1>, vector<32x128xf32>
    %c1_i32 = arith.constant 1 : i32
    %36 = vector.broadcast %c1_i32 : i32 to vector<32x128xi32>
    %37 = arith.cmpi eq, %5, %36 : vector<32x128xi32>
    %38 = arith.select %37, %9, %35 : vector<32x128xi1>, vector<32x128xf32>
    %c2_i32 = arith.constant 2 : i32
    %39 = vector.broadcast %c2_i32 : i32 to vector<32x128xi32>
    %40 = arith.cmpi eq, %5, %39 : vector<32x128xi32>
    %41 = arith.select %40, %11, %38 : vector<32x128xi1>, vector<32x128xf32>
    %c3_i32 = arith.constant 3 : i32
    %42 = vector.broadcast %c3_i32 : i32 to vector<32x128xi32>
    %43 = arith.cmpi eq, %5, %42 : vector<32x128xi32>
    %44 = arith.select %43, %13, %41 : vector<32x128xi1>, vector<32x128xf32>
    %45 = arith.subf %31, %44 : vector<32x128xf32>
    %c0_i32_19 = arith.constant 0 : i32
    %46 = vector.broadcast %c0_i32_19 : i32 to vector<32x128xi32>
    %47 = arith.cmpi sge, %5, %46 : vector<32x128xi32>
    %cst_20 = arith.constant 0.000000e+00 : f32
    %48 = vector.broadcast %cst_20 : f32 to vector<32x128xf32>
    %49 = arith.select %47, %29, %48 : vector<32x128xi1>, vector<32x128xf32>
    %cst_21 = arith.constant 0.000000e+00 : f32
    %50 = vector.broadcast %cst_21 : f32 to vector<32x128xf32>
    %51 = arith.select %47, %45, %50 : vector<32x128xi1>, vector<32x128xf32>
    %52 = arith.mulf %18, %49 : vector<32x128xf32>
    %c0_i32_22 = arith.constant 0 : i32
    %53 = vector.broadcast %c0_i32_22 : i32 to vector<32x128xi32>
    %54 = arith.cmpi eq, %5, %53 : vector<32x128xi32>
    %cst_23 = arith.constant 0.000000e+00 : f32
    %55 = vector.broadcast %cst_23 : f32 to vector<32x128xf32>
    %56 = arith.select %54, %52, %55 : vector<32x128xi1>, vector<32x128xf32>
    %cst_24 = arith.constant dense<0.000000e+00> : vector<128xf32>
    %57 = vector.multi_reduction <add>, %56, %cst_24 [0] : vector<32x128xf32> to vector<128xf32>
    %58 = vector.shape_cast %57 : vector<128xf32> to vector<1x128xf32>
    %cst_25 = arith.constant dense<0.000000e+00> : vector<128xf32>
    %59 = vector.multi_reduction <add>, %52, %cst_25 [0] : vector<32x128xf32> to vector<128xf32>
    %60 = vector.shape_cast %59 : vector<128xf32> to vector<1x128xf32>
    %61 = arith.extui %54 : vector<32x128xi1> to vector<32x128xi32>
    %62 = arith.sitofp %61 : vector<32x128xi32> to vector<32x128xf32>
    %cst_26 = arith.constant dense<0.000000e+00> : vector<128xf32>
    %63 = vector.multi_reduction <add>, %62, %cst_26 [0] : vector<32x128xf32> to vector<128xf32>
    %64 = vector.shape_cast %63 : vector<128xf32> to vector<1x128xf32>
    %65 = arith.mulf %20, %49 : vector<32x128xf32>
    %c1_i32_27 = arith.constant 1 : i32
    %66 = vector.broadcast %c1_i32_27 : i32 to vector<32x128xi32>
    %67 = arith.cmpi eq, %5, %66 : vector<32x128xi32>
    %cst_28 = arith.constant 0.000000e+00 : f32
    %68 = vector.broadcast %cst_28 : f32 to vector<32x128xf32>
    %69 = arith.select %67, %65, %68 : vector<32x128xi1>, vector<32x128xf32>
    %cst_29 = arith.constant dense<0.000000e+00> : vector<128xf32>
    %70 = vector.multi_reduction <add>, %69, %cst_29 [0] : vector<32x128xf32> to vector<128xf32>
    %71 = vector.shape_cast %70 : vector<128xf32> to vector<1x128xf32>
    %cst_30 = arith.constant dense<0.000000e+00> : vector<128xf32>
    %72 = vector.multi_reduction <add>, %65, %cst_30 [0] : vector<32x128xf32> to vector<128xf32>
    %73 = vector.shape_cast %72 : vector<128xf32> to vector<1x128xf32>
    %74 = arith.extui %67 : vector<32x128xi1> to vector<32x128xi32>
    %75 = arith.sitofp %74 : vector<32x128xi32> to vector<32x128xf32>
    %cst_31 = arith.constant dense<0.000000e+00> : vector<128xf32>
    %76 = vector.multi_reduction <add>, %75, %cst_31 [0] : vector<32x128xf32> to vector<128xf32>
    %77 = vector.shape_cast %76 : vector<128xf32> to vector<1x128xf32>
    %78 = arith.mulf %22, %49 : vector<32x128xf32>
    %c2_i32_32 = arith.constant 2 : i32
    %79 = vector.broadcast %c2_i32_32 : i32 to vector<32x128xi32>
    %80 = arith.cmpi eq, %5, %79 : vector<32x128xi32>
    %cst_33 = arith.constant 0.000000e+00 : f32
    %81 = vector.broadcast %cst_33 : f32 to vector<32x128xf32>
    %82 = arith.select %80, %78, %81 : vector<32x128xi1>, vector<32x128xf32>
    %cst_34 = arith.constant dense<0.000000e+00> : vector<128xf32>
    %83 = vector.multi_reduction <add>, %82, %cst_34 [0] : vector<32x128xf32> to vector<128xf32>
    %84 = vector.shape_cast %83 : vector<128xf32> to vector<1x128xf32>
    %cst_35 = arith.constant dense<0.000000e+00> : vector<128xf32>
    %85 = vector.multi_reduction <add>, %78, %cst_35 [0] : vector<32x128xf32> to vector<128xf32>
    %86 = vector.shape_cast %85 : vector<128xf32> to vector<1x128xf32>
    %87 = arith.extui %80 : vector<32x128xi1> to vector<32x128xi32>
    %88 = arith.sitofp %87 : vector<32x128xi32> to vector<32x128xf32>
    %cst_36 = arith.constant dense<0.000000e+00> : vector<128xf32>
    %89 = vector.multi_reduction <add>, %88, %cst_36 [0] : vector<32x128xf32> to vector<128xf32>
    %90 = vector.shape_cast %89 : vector<128xf32> to vector<1x128xf32>
    %91 = arith.mulf %24, %49 : vector<32x128xf32>
    %c3_i32_37 = arith.constant 3 : i32
    %92 = vector.broadcast %c3_i32_37 : i32 to vector<32x128xi32>
    %93 = arith.cmpi eq, %5, %92 : vector<32x128xi32>
    %cst_38 = arith.constant 0.000000e+00 : f32
    %94 = vector.broadcast %cst_38 : f32 to vector<32x128xf32>
    %95 = arith.select %93, %91, %94 : vector<32x128xi1>, vector<32x128xf32>
    %cst_39 = arith.constant dense<0.000000e+00> : vector<128xf32>
    %96 = vector.multi_reduction <add>, %95, %cst_39 [0] : vector<32x128xf32> to vector<128xf32>
    %97 = vector.shape_cast %96 : vector<128xf32> to vector<1x128xf32>
    %cst_40 = arith.constant dense<0.000000e+00> : vector<128xf32>
    %98 = vector.multi_reduction <add>, %91, %cst_40 [0] : vector<32x128xf32> to vector<128xf32>
    %99 = vector.shape_cast %98 : vector<128xf32> to vector<1x128xf32>
    %100 = arith.extui %93 : vector<32x128xi1> to vector<32x128xi32>
    %101 = arith.sitofp %100 : vector<32x128xi32> to vector<32x128xf32>
    %cst_41 = arith.constant dense<0.000000e+00> : vector<128xf32>
    %102 = vector.multi_reduction <add>, %101, %cst_41 [0] : vector<32x128xf32> to vector<128xf32>
    %103 = vector.shape_cast %102 : vector<128xf32> to vector<1x128xf32>
    %cst_42 = arith.constant dense<0.000000e+00> : vector<128xf32>
    %104 = vector.multi_reduction <add>, %51, %cst_42 [0] : vector<32x128xf32> to vector<128xf32>
    %105 = vector.shape_cast %104 : vector<128xf32> to vector<1x128xf32>
    %cst_43 = arith.constant 0.000000e+00 : f32
    %106 = vector.broadcast %cst_43 : f32 to vector<3x128xf32>
    %c0_44 = arith.constant 0 : index
    %c0_45 = arith.constant 0 : index
    %107 = vector.load %arg6[%c0_44, %c0_45] : memref<16x128xf32, #tpu.memory_space<vmem>>, vector<16x128xf32>
    %108 = tpu.concatenate %58, %71, %84, %97, %60, %73, %86, %99, %64, %77, %90, %103, %105, %106 in 0 : vector<1x128xf32>, vector<1x128xf32>, vector<1x128xf32>, vector<1x128xf32>, vector<1x128xf32>, vector<1x128xf32>, vector<1x128xf32>, vector<1x128xf32>, vector<1x128xf32>, vector<1x128xf32>, vector<1x128xf32>, vector<1x128xf32>, vector<1x128xf32>, vector<3x128xf32> -> vector<16x128xf32>
    %109 = arith.addf %107, %108 : vector<16x128xf32>
    %c0_46 = arith.constant 0 : index
    %c0_47 = arith.constant 0 : index
    %110 = vector.load %arg6[%c0_46, %c0_47] : memref<16x128xf32, #tpu.memory_space<vmem>>, vector<16x128xf32>
    tpu.vector_store %arg6[%c0_46, %c0_47], %109 {strides = array<i32>} : memref<16x128xf32, #tpu.memory_space<vmem>>, vector<16x128xf32>,
    %c0_i32_48 = arith.constant 0 : i32
    %111 = arith.cmpi eq, %arg2, %c0_i32_48 : i32
    %112 = arith.extui %111 : i1 to i32
    %c0_i32_49 = arith.constant 0 : i32
    %113 = arith.cmpi ne, %112, %c0_i32_49 : i32
    scf.if %113 {
      %c0_50 = arith.constant 0 : index
      %c0_51 = arith.constant 0 : index
      %114 = vector.load %arg6[%c0_50, %c0_51] : memref<16x128xf32, #tpu.memory_space<vmem>>, vector<16x128xf32>
      %c0_52 = arith.constant 0 : index
      %c0_53 = arith.constant 0 : index
      %c0_54 = arith.constant 0 : index
      %c0_55 = arith.constant 0 : index
      %115 = vector.load %arg5[%c0_52, %c0_53, %c0_54, %c0_55] : memref<1x1x16x128xf32, #tpu.memory_space<vmem>>, vector<1x1x16x128xf32>
      %116 = vector.shape_cast %115 : vector<1x1x16x128xf32> to vector<16x128xf32>
      %117 = vector.shape_cast %114 : vector<16x128xf32> to vector<1x1x16x128xf32>
      tpu.vector_store %arg5[%c0_52, %c0_53, %c0_54, %c0_55], %117 {strides = array<i32>} : memref<1x1x16x128xf32, #tpu.memory_space<vmem>>, vector<1x1x16x128xf32>,
    } else {
    }
    return
  }
  func.func @transform_0(%arg0: i32, %arg1: i32, %arg2: i32) -> (i32, i32, i32, i32) {
    %c1_i32 = arith.constant 1 : i32
    %0 = arith.muli %arg1, %c1_i32 : i32
    %1 = arith.addi %0, %arg2 : i32
    %c0_i32 = arith.constant 0 : i32
    %c0_i32_0 = arith.constant 0 : i32
    %c0_i32_1 = arith.constant 0 : i32
    return %arg0, %c0_i32, %1, %c0_i32_0 : i32, i32, i32, i32
  }
  func.func @transform_1(%arg0: i32, %arg1: i32, %arg2: i32) -> (i32, i32, i32, i32) {
    %c1_i32 = arith.constant 1 : i32
    %0 = arith.muli %arg1, %c1_i32 : i32
    %1 = arith.addi %0, %arg2 : i32
    %c0_i32 = arith.constant 0 : i32
    %c0_i32_0 = arith.constant 0 : i32
    %c0_i32_1 = arith.constant 0 : i32
    return %arg0, %c0_i32, %1, %c0_i32_0 : i32, i32, i32, i32
  }
  func.func @transform_2(%arg0: i32, %arg1: i32, %arg2: i32) -> (i32, i32, i32, i32) {
    %c0_i32 = arith.constant 0 : i32
    %c0_i32_0 = arith.constant 0 : i32
    %c0_i32_1 = arith.constant 0 : i32
    return %arg0, %arg1, %c0_i32, %c0_i32_0 : i32, i32, i32, i32
  }
}

</mosaic_0001>

<bundles_post_ra>
// kernel: tpu_custom_call.1
= control target key start
LH: loop header
LB: loop body
LE: loop exit
PB: predicated region body
PF: predicated region fallthrough
CT: control target
= control target key end

     0   :  { %7 = vsyncpa [#allocation4], 0  ;;  %s1696_s0 = inlined_call_operand.hbm [shape: f32[2,4,32,128], index: 0, kind: input, shape index: {}]   ;;  %s1697_s1 = inlined_call_operand.hbm [shape: s8[2,1,32,128], index: 1, kind: input, shape index: {}]   ;;  %s1698_s2 = inlined_call_operand.hbm [shape: f32[2,1,16,128], index: 2, kind: output, shape index: {}]  }
   0x1   :  { %9 = vsyncpa [#allocation4 + $0x1], 0 }
   0x2   :  { %10 = vsyncpa [#allocation7], 0 }
   0x3   :  { %12 = vsyncpa [#allocation7 + $0x1], 0 }
   0x4   :  { %13 = vsyncpa [#allocation5], 0 }
   0x5   :  { %15 = vsyncpa [#allocation5 + $0x1], 0  ;;  %s1090_s9 = smov 0   ;;  %s1092_s10 = smov 0  }
   0x6   :  { %s1094_s11 = smov 0   ;;  %s1096_s12 = smov 0  }
   0x7   :  { %s1098_s13 = smov 0   ;;  %s1100_s14 = smov 0  }
   0x8 LB: > { %s751_s15 = sadd.s32 4294967295, %s1065_s14   ;;  %s752_s16 = sadd.s32 4294967294, %s1065_s14   ;;  %s1065_s14 = sphi %s1100_s14, %s21_s14   ;;  %s1061_s13 = sphi %s1098_s13, %s1725_s13   ;;  %s1057_s12 = sphi %s1096_s12, %s1724_s12   ;;  %s1053_s11 = sphi %s1094_s11, %s1723_s11   ;;  %s1049_s10 = sphi %s1092_s10, %s1722_s10   ;;  %s1045_s9 = sphi %s1090_s9, %s1721_s9  }
   0x9   : > { %s40_s17 = sadd.s32 1, %s1061_s13  ;;  %s51_s18 = sadd.s32 1, %s1053_s11 }
   0xa   : > { %p42_p0 = scmp.ge.s32.totalorder %s40_s17, 2  ;;  %p58_p1 = scmp.ne.s32.totalorder %s1053_s11, %s1049_s10 }
   0xb   : > { %p59_p2 = scmp.eq.s32.totalorder %s1065_s14, 0  ;;  %p64_p3 = scmp.ne.s32.totalorder %s1049_s10, %s1045_s9 }
   0xc   : > { %s1727_s17 = smov (%p42_p0, %s40_s17), 0  ;;  %p65_p5 = scmp.eq.s32.totalorder %s751_s15, 0 }
   0xd   : > { %p1131_p4 = por %p59_p2, %p58_p1  ;;  %s46_s20 = ssub.s32 %s1061_s13, %s1727_s17 }
   0xe   : > { %p120_p6 = scmp.eq.s32.totalorder %s751_s15, 1  ;;  %p49_p7 = scmp.eq.s32.totalorder %s46_s20, 0 }
   0xf   : > { %p1137_p8 = por %p65_p5, %p64_p3  ;;  %p126_p10 = scmp.eq.s32.totalorder %s752_s16, 1 }
  0x10   : > { %p1141_p9 = por %p120_p6, %p58_p1  ;;  %p816_p13 = scmp.lt.s32.totalorder %s1065_s14, 2 }
  0x11   : > { %s1706_s21 = scalar_select %p1137_p8, 1, 0 }
  0x12   : > { %s1707_s22 = scalar_select %p1141_p9, 1, 0 }
  0x13   : > { %s1146_s23 = scalar_select %p49_p7, %s1053_s11, %s51_s18  }
  0x14   : > { %p1148_p11 = por %p126_p10, %p64_p3  ;;  %s1155_s25 = sand.u32 1, %s1053_s11  }
  0x15   : > { %s755_s26 = sshll.u32 %s1155_s25, 7  ;;  %s797_s27 = sshll.u32 %s1061_s13, 11 }
  0x16   : > { %s1708_s24 = scalar_select %p1148_p11, 1, 0 }
  0x17   : > { %s1162_s30 = scalar_lea.hbm %s1696_s0, %s797_s27  ;;  %s150_s3 = scalar_lea.vmem [#allocation3], %s755_s26 }
  0x18   : > { %s160_s4 = sshll.u32 %s150_s3, 4  ;;  %p1168_p0 = pnand %p816_p13, %p1131_p4  ;;  %s1164_s4 = int_to_ptr.vmem [resolvable:$true] %s160_s4 }
  0x19   : > { %s147_s6 = scalar_lea.sflag [#allocation4], %s1155_s25  ;;  %s919_s7 = scalar_lea.hbm %s1162_s30, 2048 }
  0x1a   : > { %p920_p2 = scmp.ne.s32.totalorder %s1162_s30, %s919_s7  ;;  %p921_p3 = pneg %p1168_p0 }
  0x1b   : > { %s924_s16 = scalar_lea.hbm %s1696_s0, 4096  ;;  %p925_p4 = scmp.lt.u32.totalorder %s1162_s30, %s1696_s0 }
  0x1c   : > { %p922_p5 = pnand %p921_p3, %p920_p2  ;;  %p926_p7 = scmp.lt.u32.totalorder %s924_s16, %s919_s7 }
  0x1d   : > { %p928_p13 = scmp.lt.u32.totalorder %s919_s7, %s1162_s30 }
  0x1e   : > { %p923_p6 = pneg %p922_p5  ;;  %p927_p10 = por %p926_p7, %p925_p4 }
  0x20   : > { %p929_p12 = por %p928_p13, %p927_p10 }
  0x22   : > { %p930_p1 = pnand %p929_p12, %p923_p6 }
  0x24   : > { %933 = shalt.err (!%p930_p1)
}
  0x25   : > { %s934_s20 = scalar_lea.vmem %s1164_s4, 2048  ;;  %s1067_s26 = smov [#allocation3]  }
  0x26   : > { %p935_p2 = scmp.ne.s32.totalorder %s1164_s4, %s934_s20  ;;  %s939_s27 = sshll.u32 %s1067_s26, 4  ;;  %s940_s27 = int_to_ptr.vmem [resolvable:$false] %s939_s27 }
  0x27   : > { %s941_s28 = scalar_lea.vmem %s940_s27, 4096  ;;  %p942_p9 = scmp.lt.s32.totalorder %s1164_s4, %s940_s27 }
  0x28   : > { %p937_p5 = pnand %p935_p2, %p921_p3  ;;  %p943_p4 = scmp.lt.s32.totalorder %s941_s28, %s934_s20 }
  0x2a   : > { %p938_p11 = pneg %p937_p5  ;;  %p944_p7 = por %p943_p4, %p942_p9 }
  0x2c   : > { %p945_p10 = pnand %p944_p7, %p938_p11 }
  0x2e   : > { %948 = shalt.err (!%p945_p10)
}
  0x2f   : > { %s1068_s29 = smov 128   ;;  %s1069_s3 = smov 8  }
  0x30   : > { %808 = dma.hbm_to_vmem [thread:$0]  (!%p1168_p0), %s1162_s30, 2048, %s1164_s4, %s147_s6, %s1068_s29, %s1068_s29, %s1069_s3  }
  0x31   : > { %p188_p12 = scmp.lt.s32.totalorder %s1065_s14, 3  ;;  %s758_s7 = sshll.u32 %s1155_s25, 3 }
  0x32   : > { %s759_s8 = sshll.u32 %s1061_s13, 7  ;;  %p1710_p9 = scmp.ge.s32.totalorder %s1065_s14, 1 }
  0x33   : > { %s1213_s19 = scalar_lea.hbm %s1697_s1, %s759_s8  ;;  %s174_s20 = scalar_lea.vmem [#allocation6], %s758_s7 }
  0x34   : > { %p1206_p11 = pnand %p1710_p9, %p188_p12  ;;  %s183_s26 = sshll.u32 %s174_s20, 4  ;;  %s184_s26 = int_to_ptr.vmem [resolvable:$true] %s183_s26 }
  0x35   : > { %s171_s30 = scalar_lea.sflag [#allocation7], %s1155_s25  ;;  %s949_s4 = scalar_lea.hbm %s1213_s19, 128 }
  0x36   : > { %s1711_s15 = scalar_select %p1206_p11, 1, 0 }
  0x37   : > { %p950_p1 = scmp.ne.s32.totalorder %s1213_s19, %s949_s4  ;;  %s954_s28 = scalar_lea.hbm %s1697_s1, 256 }
  0x38   : > { %p955_p2 = scmp.lt.u32.totalorder %s1213_s19, %s1697_s1  ;;  %p956_p5 = scmp.lt.u32.totalorder %s954_s28, %s949_s4 }
  0x39   : > { %p952_p6 = pnand %p950_p1, %p921_p3  ;;  %p958_p7 = scmp.lt.u32.totalorder %s949_s4, %s1213_s19 }
  0x3a   : > { %p957_p4 = por %p956_p5, %p955_p2 }
  0x3b   : > { %p953_p13 = pneg %p952_p6 }
  0x3c   : > { %p959_p10 = por %p958_p7, %p957_p4 }
  0x3e   : > { %p960_p12 = pnand %p959_p10, %p953_p13 }
  0x40   : > { %963 = shalt.err (!%p960_p12)
}
  0x41   : > { %s964_s25 = scalar_lea.vmem %s184_s26, 128  ;;  %s1070_s7 = smov [#allocation6]  }
  0x42   : > { %p965_p9 = scmp.ne.s32.totalorder %s184_s26, %s964_s25  ;;  %s969_s8 = sshll.u32 %s1070_s7, 4  ;;  %s970_s8 = int_to_ptr.vmem [resolvable:$false] %s969_s8 }
  0x43   : > { %s971_s16 = scalar_lea.vmem %s970_s8, 256  ;;  %p972_p8 = scmp.lt.s32.totalorder %s184_s26, %s970_s8 }
  0x44   : > { %p967_p1 = pnand %p965_p9, %p921_p3  ;;  %p973_p11 = scmp.lt.s32.totalorder %s971_s16, %s964_s25 }
  0x46   : > { %p968_p6 = pneg %p967_p1  ;;  %p974_p2 = por %p973_p11, %p972_p8 }
  0x48   : > { %p975_p5 = pnand %p974_p2, %p968_p6 }
  0x4a   : > { %978 = shalt.err (!%p975_p5)
}
  0x4b   : > { %811 = dma.hbm_to_vmem [thread:$0]  (!%p1168_p0), %s1213_s19, 128, %s184_s26, %s171_s30  }
  0x4c   : > { %p1712_p13 = scmp.ne.s32.totalorder %s1711_s15, 0 }
  0x4d   : > { %s1238_s18 = sand.u32 (!%p1712_p13), 1, %s1049_s10   ;;  %p1713_p3 = scmp.ne.s32.totalorder (!%p1712_p13), %s1706_s21, 0 }
  0x4e   : > { %192 = sbr.rel (%p1712_p13) target bundleno = 198 (0xc6), region = 28  ;;  %s761_s20 = sshll.u32 (!%p1712_p13), %s1238_s18, 7 }
  0x4f   : > { %s195_s4 = scalar_lea.sflag (!%p1712_p13), [#allocation4], %s1238_s18  ;;  %s198_s6 = scalar_lea.vmem (!%p1712_p13), [#allocation3], %s761_s20 }
  0x55   : > { %1032 = dma.done.wait (%p1713_p3), %s195_s4, 2048  }
  0x56   : > { %1034 = vsyncadd (%p1713_p3), %s195_s4, 4294965248  ;;  %s762_s5 = sshll.u32 %s1238_s18, 3  ;;  %s204_s15 = scalar_lea.sflag [#allocation7], %s1238_s18 }
  0x57   : > { %s1248_s19 = scalar_lea.vmem [#allocation6], %s762_s5 }
  0x58   : > { %1036 = dma.done.wait (%p1713_p3), %s204_s15, 128  }
  0x59   : > { %1038 = vsyncadd (%p1713_p3), %s204_s15, 4294967168  ;;  %v1254_v0 = vld [vmem:[%s198_s6] sm:$0xff]  ;;  %v1256_v1 = vld [vmem:[%s198_s6 + $0x8] sm:$0xff]  ;;  %s763_s21 = sshll.u32 %s1238_s18, 4  ;;  %s798_s26 = sshll.u32 %s1057_s12, 8 }
  0x5a   : > { %v1258_v2 = vld [vmem:[%s198_s6 + $0x10] sm:$0xff]  ;;  %v1260_v3 = vld [vmem:[%s198_s6 + $0x18] sm:$0xff]  ;;  %v1262_v4 = vld [vmem:[%s198_s6 + $0x20] sm:$0xff]  ;;  %s232_s30 = scalar_lea.vmem [#allocation8], %s763_s21  ;;  %s1644_s3 = scalar_lea.hbm %s1698_s2, %s798_s26 }
  0x5b   : > { %v1264_v5 = vld [vmem:[%s198_s6 + $0x28] sm:$0xff]  ;;  %v1266_v6 = vld [vmem:[%s198_s6 + $0x30] sm:$0xff]  ;;  %v1268_v7 = vld [vmem:[%s198_s6 + $0x38] sm:$0xff]  ;;  %v266_v8 = vmax.f32 %v1254_v0, %v1262_v4  ;;  %s635_s27 = sshll.u32 %s232_s30, 4  ;;  %s620_s12 = scalar_lea.sflag [#allocation5], %s1238_s18  ;;  %s1646_s27 = int_to_ptr.vmem [resolvable:$true] %s635_s27 }
  0x5c   : > { %v1272_v9 = vld [vmem:[%s198_s6 + $0x40] sm:$0xff]  ;;  %v1274_v10 = vld [vmem:[%s198_s6 + $0x48] sm:$0xff]  ;;  %v1276_v11 = vld [vmem:[%s198_s6 + $0x50] sm:$0xff]  ;;  %v267_v12 = vmax.f32 %v1256_v1, %v1264_v5  ;;  %v268_v13 = vmax.f32 %v1258_v2, %v1266_v6  ;;  %v269_v14 = vmax.f32 %v1260_v3, %v1268_v7  ;;  %s979_s25 = scalar_lea.vmem %s1646_s27, 256  ;;  %p1718_p0 = scmp.ne.s32.totalorder %s1707_s22, 0 }
  0x5d   : > { %v1284_v15 = vld [vmem:[%s198_s6 + $0x58] sm:$0xff]  ;;  %v1286_v16 = vld [vmem:[%s198_s6 + $0x60] sm:$0xff]  ;;  %v1288_v17 = vld [vmem:[%s198_s6 + $0x68] sm:$0xff]  ;;  %v270_v18 = vmax.f32 %v266_v8, %v1272_v9  ;;  %p980_p8 = scmp.ne.s32.totalorder %s1646_s27, %s979_s25  ;;  %s1072_s7 = smov [#allocation8]  }
  0x5e   : > { %v1291_v19 = vld [vmem:[%s198_s6 + $0x70] sm:$0xff]  ;;  %v1293_v20 = vld [vmem:[%s198_s6 + $0x78] sm:$0xff]  ;;  %v271_v21 = vmax.f32 %v267_v12, %v1274_v10  ;;  %v272_v22 = vmax.f32 %v268_v13, %v1276_v11  ;;  %v273_v23 = vmax.f32 %v269_v14, %v1284_v15  ;;  %v242_v50 = vld [vmem:[%s1248_s19] sm:$0xff]  ;;  %s983_s8 = sshll.u32 %s1072_s7, 4  ;;  %s984_s8 = int_to_ptr.vmem [resolvable:$false] %s983_s8 }
  0x5f   : > { %v1299_v24 = vmax.f32 %v270_v18, %v1286_v16  ;;  %v1343_v57 = vunpack.c.0.s8 %v242_v50  ;;  %v1345_v59 = vunpack.c.1.s8 %v242_v50  ;;  %v1347_v60 = vunpack.c.2.s8 %v242_v50  ;;  %p981_p11 = pnand %p980_p8, %p1718_p0  ;;  %s985_s16 = scalar_lea.vmem %s984_s8, 512 }
  0x60   : > { %v1302_v25 = vmax.f32 %v271_v21, %v1288_v17  ;;  %v1305_v26 = vmax.f32 %v272_v22, %v1291_v19  ;;  %v1308_v27 = vmax.f32 %v273_v23, %v1293_v20  ;;  %v1351_v63 = vunpack.c.3.s8 %v242_v50  ;;  %p986_p7 = scmp.lt.s32.totalorder %s1646_s27, %s984_s8  ;;  %p987_p10 = scmp.lt.s32.totalorder %s985_s16, %s979_s25 }
  0x61   : > { %v278_v28 = vsub.f32 %v1254_v0, %v1299_v24  ;;  %v290_v29 = vsub.f32 %v1262_v4, %v1299_v24  ;;  %v302_v41 = vsub.f32 %v1272_v9, %v1299_v24  ;;  %v314_v49 = vsub.f32 %v1286_v16, %v1299_v24  ;;  %p982_p4 = pneg %p981_p11 }
  0x62   : > { %v279_v30 = vsub.f32 %v1256_v1, %v1302_v25  ;;  %v280_v31 = vsub.f32 %v1258_v2, %v1305_v26  ;;  %v281_v32 = vsub.f32 %v1260_v3, %v1308_v27  ;;  %v291_v33 = vsub.f32 %v1264_v5, %v1302_v25  ;;  %p988_p12 = por %p987_p10, %p986_p7 }
  0x63   : > { %v282_v34 = vmul.f32 1.442695, %v278_v28  ;;  %v292_v35 = vsub.f32 %v1266_v6, %v1305_v26  ;;  %v293_v39 = vsub.f32 %v1268_v7, %v1308_v27  ;;  %v294_v40 = vmul.f32 1.442695, %v290_v29 }
  0x64   : > { %v284_v36 = vmul.f32 1.442695, %v279_v30  ;;  %v286_v37 = vmul.f32 1.442695, %v280_v31  ;;  %v288_v38 = vmul.f32 1.442695, %v281_v32  ;;  %v303_v43 = vsub.f32 %v1274_v10, %v1302_v25  ;;  %p989_p9 = pnand %p988_p12, %p982_p4 }
  0x65   : > { %871 = vpow2.f32 %v282_v34  ;;  %v296_v42 = vmul.f32 1.442695, %v291_v33  ;;  %v298_v44 = vmul.f32 1.442695, %v292_v35  ;;  %v304_v45 = vsub.f32 %v1276_v11, %v1305_v26 }
  0x66   : > { %873 = vpow2.f32 %v284_v36  ;;  %v300_v46 = vmul.f32 1.442695, %v293_v39  ;;  %v305_v47 = vsub.f32 %v1284_v15, %v1308_v27  ;;  %v306_v48 = vmul.f32 1.442695, %v302_v41 }
  0x67   : > { %875 = vpow2.f32 %v286_v37  ;;  %v308_v51 = vmul.f32 1.442695, %v303_v43  ;;  %v315_v52 = vsub.f32 %v1288_v17, %v1302_v25  ;;  %v310_v53 = vmul.f32 1.442695, %v304_v45 }
  0x68   : > { %877 = vpow2.f32 %v288_v38  ;;  %v316_v54 = vsub.f32 %v1291_v19, %v1305_v26  ;;  %v312_v55 = vmul.f32 1.442695, %v305_v47  ;;  %v317_v56 = vsub.f32 %v1293_v20, %v1308_v27 }
  0x69   : > { %879 = vpow2.f32 %v294_v40  ;;  %v318_v58 = vmul.f32 1.442695, %v314_v49  ;;  %v320_v61 = vmul.f32 1.442695, %v315_v52  ;;  %vm358_vm0 = vcmp.eq.s32.totalorder %v1343_v57, 0 }
  0x6a   : > { %881 = vpow2.f32 %v296_v42  ;;  %v322_v8 = vmul.f32 1.442695, %v316_v54  ;;  %v324_v13 = vmul.f32 1.442695, %v317_v56  ;;  %vm359_vm1 = vcmp.eq.s32.totalorder %v1345_v59, 0 }
  0x6b   : > { %883 = vpow2.f32 %v298_v44  ;;  %vm360_vm2 = vcmp.eq.s32.totalorder %v1347_v60, 0  ;;  %vm361_vm3 = vcmp.eq.s32.totalorder %v1351_v63, 0  ;;  %vm366_vm4 = vcmp.eq.s32.totalorder %v1343_v57, 1 }
  0x6c   : > { %885 = vpow2.f32 %v300_v46  ;;  %vm367_vm5 = vcmp.eq.s32.totalorder %v1345_v59, 1  ;;  %vm368_vm6 = vcmp.eq.s32.totalorder %v1347_v60, 1  ;;  %vm1702_vm7 = vcmp.eq.s32.totalorder %v1351_v63, 1 }
  0x6d   : > { %887 = vpow2.f32 %v306_v48  ;;  %vm1701_vm8 = vcmp.eq.s32.totalorder %v1343_v57, 2  ;;  %vm375_vm9 = vcmp.eq.s32.totalorder %v1345_v59, 2  ;;  %v1071_v22 = vmov 0.0  }
  0x6e   : > { %889 = vpow2.f32 %v308_v51  ;;  %v776_v23 = vsel %vm358_vm0, 1.0, %v1071_v22  ;;  %v777_v28 = vsel %vm359_vm1, 1.0, %v1071_v22  ;;  %v778_v31 = vsel %vm360_vm2, 1.0, %v1071_v22 }
  0x6f   : > { %v1349_v62 = vpop.eup %871  ;;  %891 = vpow2.f32 %v310_v53  ;;  %v779_v32 = vsel %vm361_vm3, 1.0, %v1071_v22  ;;  %v440_v35 = vadd.f32 %v777_v28, %v776_v23  ;;  %v780_v36 = vsel %vm366_vm4, 1.0, %v1071_v22 }
  0x70   : > { %v1354_v12 = vpop.eup %873  ;;  %893 = vpow2.f32 %v312_v55  ;;  %v781_v37 = vsel %vm367_vm5, 1.0, %v1071_v22  ;;  %v782_v40 = vsel %vm368_vm6, 1.0, %v1071_v22  ;;  %v783_v41 = vsel %vm1702_vm7, 1.0, %v1071_v22 }
  0x71   : > { %v1358_v14 = vpop.eup %875  ;;  %895 = vpow2.f32 %v318_v58  ;;  %v483_v42 = vadd.f32 %v781_v37, %v780_v36  ;;  %v441_v45 = vadd.f32 %v778_v31, %v440_v35  ;;  %v784_v46 = vsel %vm1701_vm8, 1.0, %v1071_v22 }
  0x72   : > { %v1363_v18 = vpop.eup %877  ;;  %897 = vpow2.f32 %v320_v61  ;;  %v785_v47 = vsel %vm375_vm9, 1.0, %v1071_v22  ;;  %v362_v53 = vsel %vm358_vm0, %v1254_v0, 0.0  ;;  %v363_v54 = vsel %vm359_vm1, %v1256_v1, 0.0 }
  0x73   : > { %v1368_v21 = vpop.eup %879  ;;  %899 = vpow2.f32 %v322_v8  ;;  %v484_v50 = vadd.f32 %v782_v40, %v483_v42  ;;  %v442_v55 = vadd.f32 %v779_v32, %v441_v45  ;;  %vm376_vm10 = vcmp.eq.s32.totalorder %v1347_v60, 2 }
  0x74   : > { %v1377_v29 = vpop.eup %881  ;;  %901 = vpow2.f32 %v324_v13  ;;  %v326_v30 = vadd.f32 %v1368_v21, %v1349_v62  ;;  %v526_v8 = vadd.f32 %v785_v47, %v784_v46  ;;  %vm1704_vm11 = vcmp.eq.s32.totalorder %v1343_v57, 3 }
  0x75   : > { %v1387_v33 = vpop.eup %883  ;;  %v327_v34 = vadd.f32 %v1377_v29, %v1354_v12  ;;  %v485_v61 = vadd.f32 %v783_v41, %v484_v50  ;;  %vm383_vm12 = vcmp.eq.s32.totalorder %v1345_v59, 3  ;;  %v786_v0 = vsel %vm376_vm10, 1.0, %v1071_v22 }
  0x76   : > { %v1397_v38 = vpop.eup %885  ;;  %v328_v39 = vadd.f32 %v1387_v33, %v1358_v14  ;;  %v788_v31 = vsel %vm1704_vm11, 1.0, %v1071_v22  ;;  %v789_v32 = vsel %vm383_vm12, 1.0, %v1071_v22  ;;  %vm1703_vm13 = vcmp.eq.s32.totalorder %v1351_v63, 2 }
  0x77   : > { %v1407_v43 = vpop.eup %887  ;;  %v329_v44 = vadd.f32 %v1397_v38, %v1363_v18  ;;  %vm384_vm14 = vcmp.eq.s32.totalorder %v1347_v60, 3  ;;  %v443_v36 = vrot.slane %v442_v55, 4  ;;  %v527_v40 = vadd.f32 %v786_v0, %v526_v8 }
  0x78   : > { %v1417_v48 = vpop.eup %889  ;;  %v330_v49 = vadd.f32 %v1407_v43, %v326_v30  ;;  %v364_v30 = vsel %vm360_vm2, %v1258_v2, 0.0  ;;  %v787_v42 = vsel %vm1703_vm13, 1.0, %v1071_v22  ;;  %v365_v45 = vsel %vm361_vm3, %v1260_v3, 0.0 }
  0x79   : > { %v1420_v51 = vpop.eup %891  ;;  %v331_v52 = vadd.f32 %v1417_v48, %v327_v34  ;;  %v790_v46 = vsel %vm384_vm14, 1.0, %v1071_v22  ;;  %v370_v47 = vsel %vm366_vm4, %v1262_v4, %v362_v53  ;;  %v444_v50 = vadd.f32 %v443_v36, %v442_v55 }
  0x7a   : > { %v1429_v56 = vpop.eup %893  ;;  %v332_v58 = vadd.f32 %v1420_v51, %v328_v39  ;;  %v486_v39 = vrot.slane %v485_v61, 4  ;;  %v373_v8 = vsel %vm1702_vm7, %v1268_v7, %v365_v45  ;;  %vm385_vm15 = vcmp.eq.s32.totalorder %v1351_v63, 3 }
  0x7b   : > { %v1433_v13 = vpop.eup %895  ;;  %v333_v23 = vadd.f32 %v1429_v56, %v329_v44  ;;  %v569_v44 = vadd.f32 %v789_v32, %v788_v31  ;;  %v791_v53 = vsel %vm385_vm15, 1.0, %v1071_v22  ;;  %v381_v55 = vsel %vm1703_vm13, %v1284_v15, %v373_v8 }
  0x7c   : > { %v1441_v1 = vpop.eup %897  ;;  %v334_v28 = vadd.f32 %v1433_v13, %v330_v49  ;;  %v371_v49 = vsel %vm367_vm5, %v1264_v5, %v363_v54  ;;  %v487_v3 = vadd.f32 %v486_v39, %v485_v61  ;;  %v378_v5 = vsel %vm1701_vm8, %v1272_v9, %v370_v47 }
  0x7d   : > { %v1453_v34 = vpop.eup %899  ;;  %v335_v35 = vadd.f32 %v1441_v1, %v331_v52  ;;  %v372_v52 = vsel %vm368_vm6, %v1266_v6, %v364_v30  ;;  %v570_v4 = vadd.f32 %v790_v46, %v569_v44  ;;  %v379_v6 = vsel %vm375_vm9, %v1274_v10, %v371_v49 }
  0x7e   : > { %v1458_v37 = vpop.eup %901  ;;  %v336_v2 = vadd.f32 %v1453_v34, %v332_v58  ;;  %903 = vrcp.f32 %v334_v28  ;;  %v528_v58 = vadd.f32 %v787_v42, %v527_v40  ;;  %v380_v7 = vsel %vm376_vm10, %v1276_v11, %v372_v52 }
  0x7f   : > { %v337_v41 = vadd.f32 %v1458_v37, %v333_v23  ;;  %905 = vrcp.f32 %v335_v35  ;;  %v445_v54 = vrot.slane %v444_v50, 2  ;;  %vm394_vm8 = vcmp.ge.s32.totalorder %v1343_v57, 0 }
  0x80   : > { %907 = vrcp.f32 %v336_v2  ;;  %v488_v9 = vrot.slane %v487_v3, 2  ;;  %v529_v61 = vrot.slane %v528_v58, 4  ;;  %vm395_vm7 = vcmp.ge.s32.totalorder %v1345_v59, 0 }
  0x81   : > { %909 = vrcp.f32 %v337_v41  ;;  %v571_v22 = vadd.f32 %v791_v53, %v570_v4  ;;  %v1504_v10 = vsel %vm1704_vm11, %v1286_v16, %v378_v5  ;;  %v1509_v11 = vsel %vm383_vm12, %v1288_v17, %v379_v6 }
  0x82   : > { %911 = vlog2.f32 %v334_v28  ;;  %v1514_v15 = vsel %vm384_vm14, %v1291_v19, %v380_v7  ;;  %vm396_vm13 = vcmp.ge.s32.totalorder %v1347_v60, 0  ;;  %v1520_v28 = vsel %vm385_vm15, %v1293_v20, %v381_v55 }
  0x83   : > { %913 = vlog2.f32 %v335_v35  ;;  %vm397_vm11 = vcmp.ge.s32.totalorder %v1351_v63, 0  ;;  %v446_v17 = vadd.f32 %v445_v54, %v444_v50  ;;  %v1533_v32 = vadd.f32 %v488_v9, %v487_v3 }
  0x84   : > { %915 = vlog2.f32 %v336_v2  ;;  %v530_v35 = vadd.f32 %v529_v61, %v528_v58  ;;  %v572_v40 = vrot.slane %v571_v22, 4 }
  0x85   : > { %917 = vlog2.f32 %v337_v41  ;;  %v447_v3 = vrot.slane %v446_v17, 1 }
  0x86   : > { %v531_v58 = vrot.slane %v530_v35, 2  ;;  %v1564_v54 = vadd.f32 %v572_v40, %v571_v22 }
  0x88   : > { %v904_v23 = vpop.eup %903 }
  0x89   : > { %v906_v0 = vpop.eup %905  ;;  %v1525_v16 = vsel %vm394_vm8, %v904_v23, 0.0 }
  0x8a   : > { %v908_v30 = vpop.eup %907  ;;  %v1529_v19 = vsel %vm395_vm7, %v906_v0, 0.0  ;;  %v406_v31 = vmul.f32 %v1349_v62, %v1525_v16  ;;  %v449_v39 = vmul.f32 %v1368_v21, %v1525_v16 }
  0x8b   : > { %v910_v20 = vpop.eup %909  ;;  %v1537_v36 = vsel %vm396_vm13, %v908_v30, 0.0  ;;  %v407_v2 = vmul.f32 %v1354_v12, %v1529_v19  ;;  %v450_v45 = vmul.f32 %v1377_v29, %v1529_v19  ;;  %v1573_v30 = vadd.f32 %v447_v3, %v446_v17 }
  0x8c   : > { %v912_v41 = vpop.eup %911  ;;  %v1545_v42 = vsel %vm397_vm11, %v910_v20, 0.0  ;;  %v408_v62 = vmul.f32 %v1358_v14, %v1537_v36  ;;  %v410_v44 = vsel %vm358_vm0, %v406_v31, 0.0  ;;  %v451_v5 = vmul.f32 %v1387_v33, %v1537_v36 }
  0x8d   : > { %v914_v46 = vpop.eup %913  ;;  %v347_v12 = vmul.f32 0.6931472, %v912_v41  ;;  %v409_v21 = vmul.f32 %v1363_v18, %v1545_v42  ;;  %v411_v47 = vsel %vm359_vm1, %v407_v2, 0.0  ;;  %v423_v49 = vadd.f32 %v407_v2, %v406_v31 }
  0x8e   : > { %v916_v50 = vpop.eup %915  ;;  %v412_v52 = vsel %vm360_vm2, %v408_v62, 0.0  ;;  %v414_v14 = vadd.f32 %v411_v47, %v410_v44  ;;  %v349_v4 = vmul.f32 0.6931472, %v914_v46  ;;  %v490_v18 = vrot.slane %v1533_v32, 1 }
  0x8f   : > { %v918_v8 = vpop.eup %917  ;;  %v413_v29 = vsel %vm361_vm3, %v409_v21, 0.0  ;;  %v351_v53 = vmul.f32 0.6931472, %v916_v50  ;;  %v424_v7 = vadd.f32 %v423_v49, %v408_v62  ;;  %v354_v55 = vadd.f32 %v347_v12, %v1299_v24 }
  0x90   : > { %v415_v6 = vadd.f32 %v414_v14, %v412_v52  ;;  %v452_v9 = vmul.f32 %v1397_v38, %v1545_v42  ;;  %v453_v61 = vsel %vm366_vm4, %v449_v39, 0.0  ;;  %v454_v23 = vsel %vm367_vm5, %v450_v45, 0.0 }
  0x91   : > { %v353_v0 = vmul.f32 0.6931472, %v918_v8  ;;  %v1575_v31 = vadd.f32 %v531_v58, %v530_v35  ;;  %v355_v22 = vadd.f32 %v349_v4, %v1302_v25  ;;  %v455_v24 = vsel %vm368_vm6, %v451_v5, 0.0 }
  0x92   : > { %v416_v33 = vadd.f32 %v415_v6, %v413_v29  ;;  %v492_v38 = vmul.f32 %v1407_v43, %v1525_v16  ;;  %v493_v20 = vmul.f32 %v1417_v48, %v1529_v19  ;;  %v356_v2 = vadd.f32 %v351_v53, %v1305_v26 }
  0x93   : > { %v425_v41 = vadd.f32 %v424_v7, %v409_v21  ;;  %v457_v62 = vadd.f32 %v454_v23, %v453_v61  ;;  %v390_v17 = vsub.f32 %v354_v55, %v1504_v10  ;;  %vm1714_vm0 = vcmp.eq.s32.totalorder %v1351_v63, 1 }
  0x94   : > { %v417_v40 = vrot.slane %v416_v33, 4  ;;  %v456_v35 = vsel %vm1714_vm0, %v452_v9, 0.0  ;;  %v466_v25 = vadd.f32 %v450_v45, %v449_v39  ;;  %v494_v44 = vmul.f32 %v1420_v51, %v1537_v36 }
  0x95   : > { %v357_v46 = vadd.f32 %v353_v0, %v1308_v27  ;;  %v458_v12 = vadd.f32 %v457_v62, %v455_v24  ;;  %v495_v48 = vmul.f32 %v1429_v56, %v1545_v42  ;;  %v391_v26 = vsub.f32 %v355_v22, %v1509_v11 }
  0x96   : > { %v418_v43 = vadd.f32 %v417_v40, %v416_v33  ;;  %v467_v21 = vadd.f32 %v466_v25, %v451_v5  ;;  %vm1715_vm1 = vcmp.eq.s32.totalorder %v1343_v57, 2  ;;  %v497_v47 = vsel %vm375_vm9, %v493_v20, 0.0 }
  0x97   : > { %v496_v10 = vsel %vm1715_vm1, %v492_v38, 0.0  ;;  %v392_v39 = vsub.f32 %v356_v2, %v1514_v15  ;;  %v426_v45 = vrot.slane %v425_v41, 4  ;;  %v459_v51 = vadd.f32 %v458_v12, %v456_v35 }
  0x98   : > { %v498_v27 = vsel %vm376_vm10, %v494_v44, 0.0  ;;  %v419_v49 = vrot.slane %v418_v43, 2  ;;  %v468_v50 = vadd.f32 %v467_v21, %v452_v9  ;;  %v500_v52 = vadd.f32 %v497_v47, %v496_v10 }
  0x99   : > { %v509_v56 = vadd.f32 %v493_v20, %v492_v38  ;;  %v460_v14 = vrot.slane %v459_v51, 4  ;;  %vm1716_vm2 = vcmp.eq.s32.totalorder %v1351_v63, 2  ;;  %v535_v3 = vmul.f32 %v1433_v13, %v1525_v16 }
  0x9a   : > { %v499_v11 = vsel %vm1716_vm2, %v495_v48, 0.0  ;;  %v536_v58 = vmul.f32 %v1441_v1, %v1529_v19  ;;  %v402_v15 = vsel %vm394_vm8, %v390_v17, 0.0  ;;  %v469_v8 = vrot.slane %v468_v50, 4 }
  0x9b   : > { %v501_v4 = vadd.f32 %v500_v52, %v498_v27  ;;  %v510_v29 = vadd.f32 %v509_v56, %v494_v44  ;;  %v393_v5 = vsub.f32 %v357_v46, %v1520_v28  ;;  %v403_v53 = vsel %vm395_vm7, %v391_v26, 0.0 }
  0x9c   : > { %v461_v6 = vadd.f32 %v460_v14, %v459_v51  ;;  %v537_v7 = vmul.f32 %v1453_v34, %v1537_v36  ;;  %v427_v55 = vadd.f32 %v426_v45, %v425_v41  ;;  %v538_v1 = vmul.f32 %v1458_v37, %v1545_v42 }
  0x9d   : > { %v502_v13 = vadd.f32 %v501_v4, %v499_v11  ;;  %v511_v16 = vadd.f32 %v510_v29, %v495_v48  ;;  %v420_v19 = vadd.f32 %v419_v49, %v418_v43  ;;  %vm1717_vm3 = vcmp.eq.s32.totalorder %v1343_v57, 3 }
  0x9e   : > { %v462_v9 = vrot.slane %v461_v6, 2  ;;  %v539_v61 = vsel %vm1717_vm3, %v535_v3, 0.0  ;;  %v540_v28 = vsel %vm383_vm12, %v536_v58, 0.0  ;;  %v470_v23 = vadd.f32 %v469_v8, %v468_v50 }
  0x9f   : > { %v503_v0 = vrot.slane %v502_v13, 4  ;;  %v512_v33 = vrot.slane %v511_v16, 4  ;;  %v541_v34 = vsel %vm384_vm14, %v537_v7, 0.0  ;;  %v543_v22 = vadd.f32 %v540_v28, %v539_v61 }
  0xa0   : > { %v463_v36 = vadd.f32 %v462_v9, %v461_v6  ;;  %v552_v24 = vadd.f32 %v536_v58, %v535_v3  ;;  %v574_v38 = vrot.slane %v1564_v54, 2  ;;  %v404_v37 = vsel %vm396_vm13, %v392_v39, 0.0 }
  0xa1   : > { %v504_v42 = vadd.f32 %v503_v0, %v502_v13  ;;  %v513_v57 = vadd.f32 %v512_v33, %v511_v16  ;;  %v542_v59 = vsel %vm385_vm15, %v538_v1, 0.0  ;;  %v405_v20 = vsel %vm397_vm11, %v393_v5, 0.0 }
  0xa2   : > { %v544_v2 = vadd.f32 %v543_v22, %v541_v34  ;;  %v553_v40 = vadd.f32 %v552_v24, %v537_v7  ;;  %v578_v41 = vadd.f32 %v403_v53, %v402_v15  ;;  %v421_v62 = vrot.slane %v420_v19, 1 }
  0xa3   : > { %v428_v17 = vrot.slane %v427_v55, 2  ;;  %v471_v35 = vrot.slane %v470_v23, 2  ;;  %v505_v25 = vrot.slane %v504_v42, 2  ;;  %v464_v44 = vrot.slane %v463_v36, 1 }
  0xa4   : > { %v545_v46 = vadd.f32 %v544_v2, %v542_v59  ;;  %v554_v43 = vadd.f32 %v553_v40, %v538_v1  ;;  %v579_v60 = vadd.f32 %v578_v41, %v404_v37  ;;  %v491_v12 = vadd.f32 %v490_v18, %v1533_v32 }
  0xa5   : > { %v506_v48 = vadd.f32 %v505_v25, %v504_v42  ;;  %v514_v26 = vrot.slane %v513_v57, 2  ;;  %v575_v63 = vadd.f32 %v574_v38, %v1564_v54  ;;  %v533_v21 = vrot.slane %v1575_v31, 1 }
  0xa6   : > { %v546_v10 = vrot.slane %v545_v46, 4  ;;  %v555_v47 = vrot.slane %v554_v43, 4  ;;  %v580_v39 = vadd.f32 %v579_v60, %v405_v20  ;;  %v422_v45 = vadd.f32 %v421_v62, %v420_v19 }
  0xa7   : > { %v429_v51 = vadd.f32 %v428_v17, %v427_v55  ;;  %v472_v27 = vadd.f32 %v471_v35, %v470_v23  ;;  %v507_v49 = vrot.slane %v506_v48, 1  ;;  %v465_v50 = vadd.f32 %v464_v44, %v463_v36 }
  0xa8   : > { %v547_v52 = vadd.f32 %v546_v10, %v545_v46  ;;  %v556_v56 = vadd.f32 %v555_v47, %v554_v43  ;;  %v581_v14 = vrot.slane %v580_v39, 4  ;;  %v515_v11 = vadd.f32 %v514_v26, %v513_v57 }
  0xa9   : > { %v576_v32 = vrot.slane %v575_v63, 1  ;;  %vm589_vm4 = vcmask 1040384   ;;  %vm591_vm5 = vcmask 1041408   ;;  %v534_v18 = vadd.f32 %v533_v21, %v1575_v31 }
  0xaa   : > { %v548_v54 = vrot.slane %v547_v52, 2  ;;  %v557_v3 = vrot.slane %v556_v56, 2  ;;  %v582_v58 = vadd.f32 %v581_v14, %v580_v39  ;;  %v430_v15 = vrot.slane %v429_v51, 1 }
  0xab   : > { %v473_v8 = vrot.slane %v472_v27, 1  ;;  %v508_v4 = vadd.f32 %v507_v49, %v506_v48  ;;  %v603_v29 = vsel %vm589_vm4, %v1573_v30, %v491_v12  ;;  %v590_v7 = vsel %vm589_vm4, %v422_v45, %v465_v50 }
  0xac   : > { %v549_v5 = vadd.f32 %v548_v54, %v547_v52  ;;  %v558_v53 = vadd.f32 %v557_v3, %v556_v56  ;;  %v583_v6 = vrot.slane %v582_v58, 2  ;;  %v516_v55 = vrot.slane %v515_v11, 1 }
  0xad   : > { %v577_v13 = vadd.f32 %v576_v32, %v575_v63  ;;  %v604_v31 = vsel %vm591_vm5, %v603_v29, %v534_v18  ;;  %v431_v9 = vadd.f32 %v430_v15, %v429_v51  ;;  %v592_v61 = vsel %vm591_vm5, %v590_v7, %v508_v4 }
  0xae   : > { %v550_v16 = vrot.slane %v549_v5, 1  ;;  %v559_v1 = vrot.slane %v558_v53, 1  ;;  %v584_v19 = vadd.f32 %v583_v6, %v582_v58  ;;  %vm593_vm6 = vcmask 1042432  }
  0xaf   : > { %v474_v28 = vadd.f32 %v473_v8, %v472_v27  ;;  %vm595_vm7 = vcmask 1043456   ;;  %v517_v30 = vadd.f32 %v516_v55, %v515_v11  ;;  %vm597_vm8 = vcmask 1044480  }
  0xb0   : > { %v551_v23 = vadd.f32 %v550_v16, %v549_v5  ;;  %v585_v0 = vrot.slane %v584_v19, 1  ;;  %v605_v33 = vsel %vm593_vm6, %v604_v31, %v577_v13  ;;  %v560_v34 = vadd.f32 %v559_v1, %v558_v53 }
  0xb1   : > { %vm599_vm9 = vcmask 1045504   ;;  %vm601_vm10 = vcmask 1046528  }
  0xb2   : > { %v586_v36 = vadd.f32 %v585_v0, %v584_v19  ;;  %v594_v22 = vsel %vm593_vm6, %v592_v61, %v551_v23 }
  0xb3   : > { %v596_v24 = vsel %vm595_vm7, %v594_v22, %v431_v9 }
  0xb4   : > { %v598_v38 = vsel %vm597_vm8, %v596_v24, %v474_v28  ;;  %v606_v37 = vsel %vm595_vm7, %v605_v33, %v586_v36 }
  0xb5   : > { %v600_v42 = vsel %vm599_vm9, %v598_v38, %v517_v30  ;;  %v607_v57 = vsel %vm597_vm8, %v606_v37, 0.0 }
  0xb6   : > { %v602_v59 = vsel %vm601_vm10, %v600_v42, %v560_v34  ;;  %618 = vst [vmem:[%s232_s30 + $0x8] sm:$0xff] %v607_v57 }
  0xb7   : > { %617 = vst [vmem:[%s232_s30] sm:$0xff] %v602_v59 }
  0xb8   : > { %992 = shalt.err (!%p989_p9)
}
  0xb9   : > { %s993_s20 = scalar_lea.hbm %s1644_s3, 256  ;;  %s997_s5 = scalar_lea.hbm %s1698_s2, 512 }
  0xba   : > { %p994_p1 = scmp.ne.s32.totalorder %s1644_s3, %s993_s20  ;;  %p998_p5 = scmp.lt.u32.totalorder %s1644_s3, %s1698_s2 }
  0xbb   : > { %p999_p13 = scmp.lt.u32.totalorder %s997_s5, %s993_s20  ;;  %p1001_p8 = scmp.lt.u32.totalorder %s993_s20, %s1644_s3 }
  0xbc   : > { %p995_p6 = pnand %p994_p1, %p1718_p0 }
  0xbd   : > { %p1000_p3 = por %p999_p13, %p998_p5 }
  0xbe   : > { %p996_p2 = pneg %p995_p6 }
  0xbf   : > { %p1002_p11 = por %p1001_p8, %p1000_p3 }
  0xc1   : > { %p1003_p4 = pnand %p1002_p11, %p996_p2 }
  0xc3   : > { %1006 = shalt.err (!%p1003_p4)
}
  0xc4   : > { %s1073_s21 = smov 128   ;;  %s1074_s26 = smov 8  }
  0xc5   : > { %803 = dma.vmem_to_hbm [thread:$0]  (%p1718_p0), %s1646_s27, 256, %s1644_s3, %s620_s12, %s1073_s21, %s1073_s21, %s1074_s26  }
  0xc6 PF: > { %s650_s30 = sand.u32 1, %s1045_s9   ;;  %p1719_p7 = scmp.ne.s32.totalorder %s1708_s24, 0 }
  0xc7   : > { %p1720_p10 = scmp.ge.s32.totalorder %s1065_s14, 2  ;;  %s651_s28 = scalar_lea.sflag [#allocation5], %s650_s30 }
  0xc9   : > { %p813_p12 = pnand %p1720_p10, %p1719_p7 }
  0xcb   : > { %1040 = dma.done.wait (!%p813_p12), %s651_s28, 256  }
  0xcc   : > { %1042 = vsyncadd (!%p813_p12), %s651_s28, 4294967040  ;;  %s21_s14 = sadd.s32 1, %s1065_s14   ;;  %s1721_s9 = smov %s1049_s10 }
  0xcd   : > { %p18_p9 = scmp.ge.s32.totalorder %s21_s14, 4   ;;  %s1722_s10 = smov %s1053_s11 }
  0xce   : > { %s1723_s11 = smov %s1146_s23  ;;  %s1724_s12 = smov %s1061_s13 }
  0xcf   : > { %s1725_s13 = smov %s1727_s17  ;;  %20 = sbr.rel (!%p18_p9) target bundleno = 8 (0x8), region = 97 }
  0xd6   :  { %656 = vsyncpa [#allocation4], 1 }
  0xd7   :  { %658 = vsyncpa [#allocation4 + $0x1], 1 }
  0xd8   :  { %659 = vsyncpa [#allocation7], 1 }
  0xd9   :  { %661 = vsyncpa [#allocation7 + $0x1], 1 }
  0xda   :  { %662 = vsyncpa [#allocation5], 1 }
  0xdb   :  { %664 = vsyncpa [#allocation5 + $0x1], 1 }

</bundles_post_ra>
